<compile_context>
chip_gen: v7x
topology: tpu7x:2x2x1
jax: 0.10.0
libtpu: 0.0.40
codegen_flags: <defaults>
</compile_context>

<pallas_src>
import functools

import numpy as np
import jax
import jax.numpy as jnp
from jax.experimental import pallas as pl
from jax.experimental.pallas import tpu as pltpu


def _round_up(x, m):
    return ((x + m - 1) // m) * m


# ---------------------------------------------------------------------------
# Pallas kernel: fused (patches @ W + b) followed by LayerNorm(embed_dim)
# ---------------------------------------------------------------------------
def _patch_embed_kernel(patches_ref, w_ref, params_ref, out_ref, *scratch,
                        eps, d_actual, k_actual):
    # patches_ref: (tile_n, K)   w_ref: (Kp, Dp)   params_ref: (3, Dp) = [b; g; b]
    # Padded K rows of W are zero and the staging buffer's pad lanes are zero, so
    # the matmul is exact.  Padded D columns of W/bias are zero => y == 0 there,
    # so summing over Dp lanes and dividing by the real D keeps LN stats exact.
    if scratch:
        # Stage the un-padded (tile_n, K) stream into a lane-aligned (tile_n, Kp)
        # VMEM buffer so the MXU sees a fully aligned problem.  Pad lanes are
        # re-zeroed every step (megacore-safe; trivial cost).
        pbuf = scratch[0]
        kp = pbuf.shape[1]
        pbuf[:, k_actual:] = jnp.zeros((pbuf.shape[0], kp - k_actual), pbuf.dtype)
        pbuf[:, :k_actual] = patches_ref[...]
        lhs = pbuf[...]
    else:
        lhs = patches_ref[...]

    y = jnp.dot(lhs, w_ref[...], preferred_element_type=jnp.float32)   # MXU, f32 acc
    bias = params_ref[0:1, :]
    gamma = params_ref[1:2, :]
    beta = params_ref[2:3, :]
    y = y + bias

    # LayerNorm over the real embed_dim; one-pass stats (independent XLU sums,
    # var = E[y^2] - mean^2; max(...,0) guards f32 cancellation).
    inv_d = jnp.float32(1.0 / d_actual)
    mean = jnp.sum(y, axis=-1, keepdims=True) * inv_d
    mean_sq = jnp.sum(y * y, axis=-1, keepdims=True) * inv_d
    var = jnp.maximum(mean_sq - mean * mean, 0.0)
    y_norm = (y - mean) * jax.lax.rsqrt(var + eps)
    out_ref[...] = (y_norm * gamma + beta).astype(out_ref.dtype)


# ---------------------------------------------------------------------------
# Tile / VMEM sizing derived from the device generation
# ---------------------------------------------------------------------------
def _pick_tile_and_vmem(N, K, Kp, Dp, in_bytes, out_bytes, use_kpad, tile_req):
    try:
        vmem_cap = int(pltpu.get_tpu_info().vmem_capacity_bytes)
    except Exception:  # conservative fallback (v7x per-TC size)
        vmem_cap = 64 * 1024 * 1024
    budget = int(vmem_cap * 0.45)  # leave headroom for Mosaic internal scratch

    def est(tn):
        b = 2 * tn * K * in_bytes            # streamed patches, double-buffered
        if use_kpad:
            b += tn * Kp * in_bytes          # lane-alignment staging scratch
        b += 2 * Kp * Dp * in_bytes          # resident weight (double-buffered)
        b += 2 * 3 * Dp * 4                  # packed bias/gamma/beta
        b += 2 * tn * Dp * out_bytes         # output tile, double-buffered
        b += 4 * tn * Dp * 4                 # f32 LN intermediates (headroom)
        return b

    tile_n = max(8, min(_round_up(tile_req, 8), _round_up(N, 8)))
    while tile_n > 8 and est(tile_n) > budget:
        tile_n = max(8, _round_up(tile_n // 2, 8))

    vmem_limit = int(min(max(est(tile_n) * 1.5 + (8 << 20), 32 << 20),
                         0.6 * vmem_cap))
    return tile_n, vmem_limit


# ---------------------------------------------------------------------------
# pallas_call wrapper
# ---------------------------------------------------------------------------
def patch_embed_pallas(patches, w_mat, bias, gamma, beta, *, eps=1e-5,
                       tile_n=1024, compute_dtype=jnp.bfloat16,
                       out_dtype=jnp.float32):
    """patches: (N, K) already in compute_dtype, w_mat: (K, D),
    bias/gamma/beta: (D,).  Returns (N, D) in out_dtype."""
    N, K = patches.shape
    K2, D = w_mat.shape
    assert K2 == K

    Kp = _round_up(K, 128)   # MXU / lane alignment for the resident weight
    Dp = _round_up(D, 128)   # lane-dense output stores
    use_kpad = Kp != K
    in_bytes = np.dtype(compute_dtype).itemsize
    out_bytes = np.dtype(out_dtype).itemsize

    tile_n, vmem_limit = _pick_tile_and_vmem(
        N, K, Kp, Dp, in_bytes, out_bytes, use_kpad, tile_n)

    # Resident / tiny operands: padded weight and packed LN params (done once).
    w_p = jnp.zeros((Kp, Dp), compute_dtype).at[:K, :D].set(
        w_mat.astype(compute_dtype))
    params = jnp.zeros((3, Dp), jnp.float32)
    params = params.at[0, :D].set(bias.astype(jnp.float32))
    params = params.at[1, :D].set(gamma.astype(jnp.float32))
    params = params.at[2, :D].set(beta.astype(jnp.float32))

    grid = (pl.cdiv(N, tile_n),)   # no row padding; Pallas clips the last block
    scratch_shapes = [pltpu.VMEM((tile_n, Kp), compute_dtype)] if use_kpad else []

    kernel = functools.partial(_patch_embed_kernel, eps=eps,
                               d_actual=D, k_actual=K)
    out_p = pl.pallas_call(
        kernel,
        out_shape=jax.ShapeDtypeStruct((N, Dp), out_dtype),
        grid_spec=pltpu.PrefetchScalarGridSpec(
            num_scalar_prefetch=0,
            grid=grid,
            in_specs=[
                pl.BlockSpec((tile_n, K), lambda i: (i, 0)),   # streamed patches
                pl.BlockSpec((Kp, Dp), lambda i: (0, 0)),      # resident weight
                pl.BlockSpec((3, Dp), lambda i: (0, 0)),       # bias/gamma/beta
            ],
            out_specs=pl.BlockSpec((tile_n, Dp), lambda i: (i, 0)),
            scratch_shapes=scratch_shapes,
        ),
        compiler_params=pltpu.CompilerParams(
            dimension_semantics=("parallel",),
            vmem_limit_bytes=vmem_limit),
    )(patches, w_p, params)

    # Lane padding only exists when D is not a multiple of 128; otherwise this is
    # a no-op (no extra HBM pass).
    return out_p[:, :D] if Dp != D else out_p


# ---------------------------------------------------------------------------
# Glue: im2col (NCHW -> (B*Ho*Wo, C*kh*kw)), emitted once in compute_dtype
# ---------------------------------------------------------------------------
def im2col_nchw(x, kh, kw, stride, pad, dtype):
    B, C, H, W = x.shape
    xp = jnp.pad(x, ((0, 0), (0, 0), (pad, pad), (pad, pad))).astype(dtype)
    Ho = (H + 2 * pad - kh) // stride + 1
    Wo = (W + 2 * pad - kw) // stride + 1
    cols = []
    for i in range(kh):
        for j in range(kw):
            cols.append(xp[:, :, i:i + stride * Ho:stride,
                              j:j + stride * Wo:stride])   # (B, C, Ho, Wo)
    patches = jnp.stack(cols, axis=0).reshape(kh, kw, B, C, Ho, Wo)
    # -> (B, Ho, Wo, C, kh, kw): token order matches torch flatten(2).transpose
    patches = patches.transpose(2, 4, 5, 3, 0, 1)
    return patches.reshape(B * Ho * Wo, C * kh * kw), Ho, Wo


# ---------------------------------------------------------------------------
# Module wrapper (mirrors OverlapPatchEmbed.forward)
# ---------------------------------------------------------------------------
@functools.partial(jax.jit, static_argnames=("patch_size", "stride",
                                             "compute_dtype", "out_dtype",
                                             "tile_n"))
def _overlap_patch_embed_impl(x, conv_w, conv_b, ln_gamma, ln_beta,
                              patch_size, stride, compute_dtype, out_dtype,
                              tile_n):
    D, C, kh, kw = conv_w.shape
    pad = patch_size // 2
    patches, _, _ = im2col_nchw(x, kh, kw, stride, pad, compute_dtype)  # (N, K)
    w_mat = conv_w.reshape(D, C * kh * kw).T                            # (K, D)
    return patch_embed_pallas(patches, w_mat, conv_b, ln_gamma, ln_beta,
                              compute_dtype=compute_dtype,
                              out_dtype=out_dtype, tile_n=tile_n)


def overlap_patch_embed(x, conv_w, conv_b, ln_gamma, ln_beta,
                        patch_size, stride, *, compute_dtype=jnp.bfloat16,
                        out_dtype=jnp.float32, tile_n=1024):
    """x: (B, C, H, W) NCHW, conv_w: (D, C, kh, kw) torch layout.
    Returns (out (B, Ho*Wo, D), Ho, Wo)."""
    B, _, H, W = x.shape
    D = conv_w.shape[0]
    pad = patch_size // 2
    Ho = (H + 2 * pad - patch_size) // stride + 1
    Wo = (W + 2 * pad - patch_size) // stride + 1
    out_flat = _overlap_patch_embed_impl(
        x, conv_w, conv_b, ln_gamma, ln_beta,
        patch_size, stride, compute_dtype, out_dtype, tile_n)
    return out_flat.reshape(B, Ho * Wo, D), Ho, Wo


# ---------------------------------------------------------------------------
# Pure-JAX reference (for sanity check)
# ---------------------------------------------------------------------------
def reference(x, conv_w, conv_b, ln_gamma, ln_beta, patch_size, stride,
              eps=1e-5):
    pad = patch_size // 2
    y = jax.lax.conv_general_dilated(
        x, conv_w, window_strides=(stride, stride),
        padding=((pad, pad), (pad, pad)),
        dimension_numbers=("NCHW", "OIHW", "NCHW"))
    y = y + conv_b[None, :, None, None]
    B, D, Ho, Wo = y.shape
    y = y.reshape(B, D, Ho * Wo).transpose(0, 2, 1)            # (B, N, D)
    mean = jnp.mean(y, axis=-1, keepdims=True)
    var = jnp.mean((y - mean) ** 2, axis=-1, keepdims=True)
    y = (y - mean) / jnp.sqrt(var + eps)
    return y * ln_gamma + ln_beta, Ho, Wo


if __name__ == "__main__":
    # Small shapes consistent with the module: img 16x16, patch 7, stride 4.
    B, C, H, W = 2, 4, 16, 16
    patch_size, stride, embed_dim = 7, 4, 32

    key = jax.random.PRNGKey(0)
    kx, kw = jax.random.split(key)
    x = jax.random.normal(kx, (B, C, H, W), dtype=jnp.float32)

    # Deterministic init following the module's _init_weights:
    #   Conv2d: normal(0, sqrt(2 / fan_out)), bias = 0
    #   LayerNorm: weight = 1, bias = 0
    fan_out = patch_size * patch_size * embed_dim
    conv_w = jax.random.normal(
        kw, (embed_dim, C, patch_size, patch_size), dtype=jnp.float32
    ) * jnp.sqrt(2.0 / fan_out)
    conv_b = jnp.zeros((embed_dim,), dtype=jnp.float32)
    ln_gamma = jnp.ones((embed_dim,), dtype=jnp.float32)
    ln_beta = jnp.zeros((embed_dim,), dtype=jnp.float32)

    ref, Ho_r, Wo_r = reference(
        x, conv_w, conv_b, ln_gamma, ln_beta, patch_size, stride)

    # Fast path: bf16 streamed inputs (f32 MXU accumulation + f32 LayerNorm).
    out, Ho, Wo = overlap_patch_embed(
        x, conv_w, conv_b, ln_gamma, ln_beta, patch_size, stride)
    out = jax.block_until_ready(out)
    assert (Ho, Wo) == (Ho_r, Wo_r)
    assert out.shape == (B, Ho * Wo, embed_dim)
    assert jnp.allclose(out, ref, atol=5e-2, rtol=5e-2)

    # f32 path: exactness check of the kernel itself (tight tolerance).
    out_f32, _, _ = overlap_patch_embed(
        x, conv_w, conv_b, ln_gamma, ln_beta, patch_size, stride,
        compute_dtype=jnp.float32)
    out_f32 = jax.block_until_ready(out_f32)
    assert jnp.allclose(out_f32, ref, atol=1e-4, rtol=1e-4)

    print("KERNEL_OK")
</pallas_src>

<mosaic_0001>
module attributes {stable_mosaic.version = 11 : i64} {
  func.func @_patch_embed_kernel(%arg0: i32, %arg1: memref<32x196xbf16, #tpu.memory_space<vmem>>, %arg2: memref<256x128xbf16, #tpu.memory_space<vmem>>, %arg3: memref<3x128xf32, #tpu.memory_space<vmem>>, %arg4: memref<32x128xf32, #tpu.memory_space<vmem>>, %arg5: memref<32x256xbf16, #tpu.memory_space<vmem>>) attributes {dimension_semantics = [#tpu.dimension_semantics<parallel>], iteration_bounds = array<i64: 1>, scalar_prefetch = 0 : i64, scratch_operands = 1 : i64, tpu.core_type = #tpu.core_type<tc>, window_params = [{transform_indices = @transform_0, window_bounds = array<i64: 32, 196>}, {pipeline_mode = #tpu.pipeline_mode<synchronous>, transform_indices = @transform_1, window_bounds = array<i64: 256, 128>}, {pipeline_mode = #tpu.pipeline_mode<synchronous>, transform_indices = @transform_2, window_bounds = array<i64: 3, 128>}, {transform_indices = @transform_3, window_bounds = array<i64: 32, 128>}]} {
    %cst = arith.constant 0.000000e+00 : bf16
    %0 = vector.broadcast %cst : bf16 to vector<32x60xbf16>
    %c0 = arith.constant 0 : index
    %c196 = arith.constant 196 : index
    %1 = vector.load %arg5[%c0, %c196] : memref<32x256xbf16, #tpu.memory_space<vmem>>, vector<32x60xbf16>
    tpu.vector_store %arg5[%c0, %c196], %0 {strides = array<i32>} : memref<32x256xbf16, #tpu.memory_space<vmem>>, vector<32x60xbf16>,
    %c0_0 = arith.constant 0 : index
    %c0_1 = arith.constant 0 : index
    %2 = vector.load %arg1[%c0_0, %c0_1] : memref<32x196xbf16, #tpu.memory_space<vmem>>, vector<32x196xbf16>
    %c0_2 = arith.constant 0 : index
    %c0_3 = arith.constant 0 : index
    %3 = vector.load %arg5[%c0_2, %c0_3] : memref<32x256xbf16, #tpu.memory_space<vmem>>, vector<32x196xbf16>
    tpu.vector_store %arg5[%c0_2, %c0_3], %2 {strides = array<i32>} : memref<32x256xbf16, #tpu.memory_space<vmem>>, vector<32x196xbf16>,
    %c0_4 = arith.constant 0 : index
    %c0_5 = arith.constant 0 : index
    %4 = vector.load %arg5[%c0_4, %c0_5] : memref<32x256xbf16, #tpu.memory_space<vmem>>, vector<32x256xbf16>
    %c0_6 = arith.constant 0 : index
    %c0_7 = arith.constant 0 : index
    %5 = vector.load %arg2[%c0_6, %c0_7] : memref<256x128xbf16, #tpu.memory_space<vmem>>, vector<256x128xbf16>
    %cst_8 = arith.constant dense<0.000000e+00> : vector<32x128xf32>
    %6 = tpu.matmul %4, %5, %cst_8 {dimension_numbers = #tpu.dot_dimension_numbers<[1], [0], [0], [1], [0, 0, 1, 1], [], []>} : vector<32x256xbf16>, vector<256x128xbf16>, vector<32x128xf32> -> vector<32x128xf32>
    %c0_9 = arith.constant 0 : index
    %c0_10 = arith.constant 0 : index
    %7 = vector.load %arg3[%c0_9, %c0_10] : memref<3x128xf32, #tpu.memory_space<vmem>>, vector<1x128xf32>
    %c1 = arith.constant 1 : index
    %c0_11 = arith.constant 0 : index
    %8 = vector.load %arg3[%c1, %c0_11] : memref<3x128xf32, #tpu.memory_space<vmem>>, vector<1x128xf32>
    %c2 = arith.constant 2 : index
    %c0_12 = arith.constant 0 : index
    %9 = vector.load %arg3[%c2, %c0_12] : memref<3x128xf32, #tpu.memory_space<vmem>>, vector<1x128xf32>
    %10 = vector.broadcast %7 : vector<1x128xf32> to vector<32x128xf32>
    %11 = arith.addf %6, %10 : vector<32x128xf32>
    %cst_13 = arith.constant dense<0.000000e+00> : vector<32xf32>
    %12 = vector.multi_reduction <add>, %11, %cst_13 [1] : vector<32x128xf32> to vector<32xf32>
    %13 = vector.shape_cast %12 : vector<32xf32> to vector<32x1xf32>
    %cst_14 = arith.constant 3.125000e-02 : f32
    %14 = vector.broadcast %cst_14 : f32 to vector<32x1xf32>
    %15 = arith.mulf %13, %14 : vector<32x1xf32>
    %16 = arith.mulf %11, %11 : vector<32x128xf32>
    %cst_15 = arith.constant dense<0.000000e+00> : vector<32xf32>
    %17 = vector.multi_reduction <add>, %16, %cst_15 [1] : vector<32x128xf32> to vector<32xf32>
    %18 = vector.shape_cast %17 : vector<32xf32> to vector<32x1xf32>
    %cst_16 = arith.constant 3.125000e-02 : f32
    %19 = vector.broadcast %cst_16 : f32 to vector<32x1xf32>
    %20 = arith.mulf %18, %19 : vector<32x1xf32>
    %21 = arith.mulf %15, %15 : vector<32x1xf32>
    %22 = arith.subf %20, %21 : vector<32x1xf32>
    %cst_17 = arith.constant 0.000000e+00 : f32
    %23 = vector.broadcast %cst_17 : f32 to vector<32x1xf32>
    %24 = arith.maximumf %22, %23 : vector<32x1xf32>
    %25 = vector.broadcast %15 : vector<32x1xf32> to vector<32x128xf32>
    %26 = arith.subf %11, %25 : vector<32x128xf32>
    %cst_18 = arith.constant 9.99999974E-6 : f32
    %27 = vector.broadcast %cst_18 : f32 to vector<32x1xf32>
    %28 = arith.addf %24, %27 : vector<32x1xf32>
    %29 = math.rsqrt %28 : vector<32x1xf32>
    %30 = vector.broadcast %29 : vector<32x1xf32> to vector<32x128xf32>
    %31 = arith.mulf %26, %30 : vector<32x128xf32>
    %32 = vector.broadcast %8 : vector<1x128xf32> to vector<32x128xf32>
    %33 = arith.mulf %31, %32 : vector<32x128xf32>
    %34 = vector.broadcast %9 : vector<1x128xf32> to vector<32x128xf32>
    %35 = arith.addf %33, %34 : vector<32x128xf32>
    %c0_19 = arith.constant 0 : index
    %c0_20 = arith.constant 0 : index
    %36 = vector.load %arg4[%c0_19, %c0_20] : memref<32x128xf32, #tpu.memory_space<vmem>>, vector<32x128xf32>
    tpu.vector_store %arg4[%c0_19, %c0_20], %35 {strides = array<i32>} : memref<32x128xf32, #tpu.memory_space<vmem>>, vector<32x128xf32>,
    return
  }
  func.func @transform_0(%arg0: i32) -> (i32, i32) {
    %c0_i32 = arith.constant 0 : i32
    %c0_i32_0 = arith.constant 0 : i32
    return %arg0, %c0_i32 : i32, i32
  }
  func.func @transform_1(%arg0: i32) -> (i32, i32) {
    %c0_i32 = arith.constant 0 : i32
    %c0_i32_0 = arith.constant 0 : i32
    %c0_i32_1 = arith.constant 0 : i32
    return %c0_i32, %c0_i32_0 : i32, i32
  }
  func.func @transform_2(%arg0: i32) -> (i32, i32) {
    %c0_i32 = arith.constant 0 : i32
    %c0_i32_0 = arith.constant 0 : i32
    %c0_i32_1 = arith.constant 0 : i32
    return %c0_i32, %c0_i32_0 : i32, i32
  }
  func.func @transform_3(%arg0: i32) -> (i32, i32) {
    %c0_i32 = arith.constant 0 : i32
    %c0_i32_0 = arith.constant 0 : i32
    return %arg0, %c0_i32 : i32, i32
  }
}

</mosaic_0001>

<bundles_post_ra>
// kernel: _overlap_patch_embed_impl.1
= control target key start
LH: loop header
LB: loop body
LE: loop exit
PB: predicated region body
PF: predicated region fallthrough
CT: control target
= control target key end

     0   :  { %vm16_vm0 = vcmask 1048096   ;;  %v451_v3 = vmov 0   ;;  %vm44_vm1 = vcmask 556032   ;;  %s570_s0 = inlined_call_operand.vmem [shape: bf16[32,196], index: 0, kind: input, shape index: {}]   ;;  %s571_s1 = inlined_call_operand.vmem [shape: bf16[256,128], index: 1, kind: input, shape index: {}]   ;;  %s572_s2 = inlined_call_operand.vmem [shape: f32[3,128], index: 2, kind: input, shape index: {}]   ;;  %s573_s3 = inlined_call_operand.hbm [shape: f32[32,128], index: 3, kind: output, shape index: {}]  }
   0x1   :  { %v399_v0 = vld [vmem:[%s571_s1 + $0x40] sm:$0xff]   ;;  %v401_v2 = vld [vmem:[%s571_s1 + $0x48] sm:$0xff]   ;;  %17 = vst.msk [vmem:[#allocation2 + $0x8] sm:$0xff] %vm16_vm0, %v451_v3  ;;  %18 = vst.msk [vmem:[#allocation2 + $0x18] sm:$0xff] %vm16_vm0, %v451_v3 }
   0x2   :  { %v400_v1 = vld [vmem:[%s571_s1] sm:$0xff]   ;;  %351 = vmatprep.subr.bf16.mxu0 %v399_v0  ;;  %379 = vmatprep.subr.bf16.mxu1 %v399_v0  ;;  %v402_v4 = vld [vmem:[%s571_s1 + $0x8] sm:$0xff]   ;;  %v403_v5 = vld [vmem:[%s571_s1 + $0x50] sm:$0xff]  }
   0x3   :  { %352 = vmatpush3.bf16.msra.mxu0 %v400_v1  ;;  %387 = vmatpush3.bf16.msra.mxu1 %v400_v1  ;;  %v404_v6 = vld [vmem:[%s571_s1 + $0x10] sm:$0xff]   ;;  %v405_v7 = vld [vmem:[%s571_s1 + $0x58] sm:$0xff]   ;;  %v407_v9 = vld [vmem:[%s571_s1 + $0x60] sm:$0xff]  }
   0x4   :  { %353 = vmatprep.subr.bf16.mxu0 %v401_v2  ;;  %380 = vmatprep.subr.bf16.mxu1 %v401_v2  ;;  %v406_v8 = vld [vmem:[%s571_s1 + $0x18] sm:$0xff]   ;;  %v408_v10 = vld [vmem:[%s571_s1 + $0x20] sm:$0xff]   ;;  %v409_v11 = vld [vmem:[%s571_s1 + $0x68] sm:$0xff]  }
   0x5   :  { %v19_v12 = vld [vmem:[%s570_s0] sm:$0xff]  ;;  %v20_v13 = vld [vmem:[%s570_s0 + $0x8] sm:$0xff]  ;;  %v21_v15 = vld [vmem:[%s570_s0 + $0x10] sm:$0xff] }
   0x6   :  { %v415_v14 = vld [vmem:[%s570_s0 + $0x4] ss:$8 sps:$4 sm:$0xff]   ;;  %v22_v16 = vld [vmem:[%s570_s0 + $0x18] sm:$0xff]  ;;  %v328_v18 = vcombine.low %v19_v12, %v20_v13 }
   0x7   :  { %354 = vmatpush3.bf16.msra.mxu0 %v402_v4  ;;  %388 = vmatpush3.bf16.msra.mxu1 %v402_v4  ;;  %v417_v17 = vld [vmem:[%s570_s0 + $0x14] ss:$8 sps:$4 sm:$0xff]   ;;  %45 = vst.msk [vmem:[#allocation2 + $0x8] sm:$0xff] %vm44_vm1, %v415_v14  ;;  %v330_v19 = vcombine.low %v21_v15, %v22_v16 }
   0x8   :  { %355 = vmatprep.subr.bf16.mxu0 %v403_v5  ;;  %381 = vmatprep.subr.bf16.mxu1 %v403_v5 }
   0xb   :  { %356 = vmatpush3.bf16.msra.mxu0 %v404_v6  ;;  %389 = vmatpush3.bf16.msra.mxu1 %v404_v6 }
   0xc   :  { %357 = vmatprep.subr.bf16.mxu0 %v405_v7  ;;  %382 = vmatprep.subr.bf16.mxu1 %v405_v7 }
   0xf   :  { %358 = vmatpush3.bf16.msra.mxu0 %v406_v8  ;;  %390 = vmatpush3.bf16.msra.mxu1 %v406_v8 }
  0x10   :  { %359 = vmatprep.subr.bf16.mxu0 %v407_v9  ;;  %383 = vmatprep.subr.bf16.mxu1 %v407_v9 }
  0x11   :  { %8 = vsyncpa [#allocation4], 0  ;;  %v410_v20 = vld [vmem:[%s571_s1 + $0x28] sm:$0xff]   ;;  %47 = vst.msk [vmem:[#allocation2 + $0x18] sm:$0xff] %vm44_vm1, %v417_v17  ;;  %v411_v21 = vld [vmem:[%s571_s1 + $0x70] sm:$0xff]   ;;  %s452_s6 = smov [#allocation3]  }
  0x12   :  { %v412_v22 = vld [vmem:[%s571_s1 + $0x30] sm:$0xff]   ;;  %v413_v23 = vld [vmem:[%s571_s1 + $0x78] sm:$0xff]   ;;  %v49_v24 = vld [vmem:[#allocation2 + $0x8] sm:$0xff]  ;;  %s317_s7 = sshll.u32 %s452_s6, 4  ;;  %s318_s7 = int_to_ptr.vmem [resolvable:$true] %s317_s7 }
  0x13   :  { %360 = vmatpush3.bf16.msra.mxu0 %v408_v10  ;;  %391 = vmatpush3.bf16.msra.mxu1 %v408_v10  ;;  %v414_v26 = vld [vmem:[%s571_s1 + $0x38] sm:$0xff]   ;;  %v332_v29 = vld [vmem:[%s572_s2] ss:$0 sm:$0xff]  ;;  %p432_p1 = scmp.lt.s32.totalorder %s318_s7, %s318_s7 }
  0x14   :  { %361 = vmatprep.subr.bf16.mxu0 %v409_v11  ;;  %384 = vmatprep.subr.bf16.mxu1 %v409_v11 }
  0x15   :  { %219 = vmatprep.mubr.bf16.mxu0 %v49_v24 }
  0x17   :  { %362 = vmatpush3.bf16.msra.mxu0 %v410_v20  ;;  %392 = vmatpush3.bf16.msra.mxu1 %v410_v20 }
  0x18   :  { %363 = vmatprep.subr.bf16.mxu0 %v411_v21  ;;  %385 = vmatprep.subr.bf16.mxu1 %v411_v21  ;;  %v51_v25 = vld [vmem:[#allocation2 + $0x18] sm:$0xff] }
  0x19   :  { %227 = vmatprep.mubr.bf16.mxu1 %v51_v25 }
  0x1b   :  { %364 = vmatpush3.bf16.msra.mxu0 %v412_v22  ;;  %393 = vmatpush3.bf16.msra.mxu1 %v412_v22 }
  0x1c   :  { %365 = vmatprep.subr.bf16.mxu0 %v413_v23  ;;  %386 = vmatprep.subr.bf16.mxu1 %v413_v23  ;;  %v350_v23 = vld [vmem:[%s572_s2 + $0x2] ss:$0 sm:$0xff] }
  0x1f   :  { %366 = vmatpush3.bf16.msra.mxu0 %v414_v26  ;;  %394 = vmatpush3.bf16.msra.mxu1 %v414_v26 }
  0x22   :  { %220 = vmatmul.mubr.bf16.vlgmr.msra.gmra.mrb[0].mxu0 %v328_v18  ;;  %228 = vmatmul.mubr.bf16.vlgmr.msra.gmra.mrb[0].mxu1 %v330_v19  ;;  %v349_v19 = vld [vmem:[%s572_s2 + $0x1] ss:$0 sm:$0xff]  ;;  %s427_s2 = scalar_lea.vmem %s318_s7, 512 }
  0x23   :  { %p428_p0 = scmp.ne.s32.totalorder %s318_s7, %s427_s2  ;;  %p433_p2 = scmp.lt.s32.totalorder %s427_s2, %s427_s2 }
  0x25   :  { %p434_p3 = por %p433_p2, %p432_p1 }
  0x27   :  { %p435_p4 = pnand %p434_p3, %p428_p0 }
  0xf5   :  { %v367_v27 = vpop.f32.mrb[0].mxu0  ;;  %v373_v28 = vpop.f32.mrb[0].mxu1 }
  0xf6   :  { %v368_v30 = vpop.f32.mrb[1].mxu0  ;;  %v374_v31 = vpop.f32.mrb[1].mxu1 }
  0xf7   :  { %v369_v32 = vadd.f32 %v368_v30, %v367_v27  ;;  %v375_v33 = vadd.f32 %v374_v31, %v373_v28  ;;  %v370_v34 = vpop.f32.mrb[2].mxu0  ;;  %v376_v35 = vpop.f32.mrb[2].mxu1 }
  0xf8   :  { %v371_v36 = vpop.f32.mrb[3].mxu0  ;;  %v377_v37 = vpop.f32.mrb[3].mxu1 }
  0xf9   :  { %v222_v38 = vadd.f32 %v369_v32, %v332_v29  ;;  %v546_v39 = vadd.f32 %v375_v33, %v332_v29  ;;  %v372_v40 = vadd.f32 %v371_v36, %v370_v34  ;;  %v378_v41 = vadd.f32 %v377_v37, %v376_v35 }
  0xfb   :  { %240 = vadd.xlane.f32.xlu1 %v546_v39  ;;  %236 = vadd.xlane.f32.xlu0 %v222_v38  ;;  %v225_v42 = vadd.f32 %v372_v40, %v332_v29  ;;  %v233_v43 = vadd.f32 %v378_v41, %v332_v29  ;;  %v248_v45 = vmul.f32 %v222_v38, %v222_v38 }
  0xfc   :  { %v250_v47 = vmul.f32 %v546_v39, %v546_v39 }
  0xfd   :  { %v249_v44 = vmul.f32 %v225_v42, %v225_v42  ;;  %v251_v46 = vmul.f32 %v233_v43, %v233_v43 }
  0xff   :  { %242 = vadd.xlane.f32.xlu1 %v233_v43  ;;  %238 = vadd.xlane.f32.xlu0 %v225_v42 }
 0x103   :  { %254 = vadd.xlane.f32.xlu1 %v249_v44  ;;  %252 = vadd.xlane.f32.xlu0 %v248_v45 }
 0x107   :  { %258 = vadd.xlane.f32.xlu1 %v251_v46  ;;  %256 = vadd.xlane.f32.xlu0 %v250_v47 }
 0x188   :  { %v241_v48 = vpop.xlane.xlu1 %240  ;;  %v237_v49 = vpop.xlane.xlu0 %236 }
 0x189   :  { %v244_v52 = vmul.f32 0.03125, %v237_v49  ;;  %v246_v54 = vmul.f32 0.03125, %v241_v48 }
 0x18b   :  { %v264_v58 = vmul.f32 %v244_v52, %v244_v52  ;;  %v266_v0 = vmul.f32 %v246_v54, %v246_v54  ;;  %v276_v18 = vsub.f32 %v222_v38, %v244_v52  ;;  %v278_v27 = vsub.f32 %v546_v39, %v246_v54 }
 0x18c   :  { %v243_v50 = vpop.xlane.xlu1 %242  ;;  %v239_v51 = vpop.xlane.xlu0 %238 }
 0x18d   :  { %v245_v53 = vmul.f32 0.03125, %v239_v51  ;;  %v247_v55 = vmul.f32 0.03125, %v243_v50 }
 0x18f   :  { %v265_v59 = vmul.f32 %v245_v53, %v245_v53  ;;  %v267_v1 = vmul.f32 %v247_v55, %v247_v55  ;;  %v277_v16 = vsub.f32 %v225_v42, %v245_v53  ;;  %v279_v24 = vsub.f32 %v233_v43, %v247_v55 }
 0x190   :  { %v255_v56 = vpop.xlane.xlu1 %254  ;;  %v253_v57 = vpop.xlane.xlu0 %252 }
 0x191   :  { %v261_v60 = vmul.f32 0.03125, %v255_v56  ;;  %v260_v61 = vmul.f32 0.03125, %v253_v57 }
 0x193   :  { %v269_v62 = vsub.f32 %v261_v60, %v265_v59  ;;  %v268_v63 = vsub.f32 %v260_v61, %v264_v58 }
 0x194   :  { %v259_v2 = vpop.xlane.xlu1 %258  ;;  %v257_v3 = vpop.xlane.xlu0 %256 }
 0x195   :  { %v273_v4 = vmax.f32 %v269_v62, 0.0  ;;  %v272_v5 = vmax.f32 %v268_v63, 0.0  ;;  %v263_v6 = vmul.f32 0.03125, %v259_v2  ;;  %v262_v7 = vmul.f32 0.03125, %v257_v3 }
 0x197   :  { %v281_v8 = vadd.f32 1e-05, %v273_v4  ;;  %v280_v9 = vadd.f32 1e-05, %v272_v5  ;;  %v271_v10 = vsub.f32 %v263_v6, %v267_v1  ;;  %v270_v11 = vsub.f32 %v262_v7, %v266_v0 }
 0x199   :  { %419 = vrsqrt.f32 %v281_v8  ;;  %v275_v12 = vmax.f32 %v271_v10, 0.0  ;;  %v274_v13 = vmax.f32 %v270_v11, 0.0 }
 0x19a   :  { %421 = vrsqrt.f32 %v280_v9 }
 0x19b   :  { %v283_v14 = vadd.f32 1e-05, %v275_v12  ;;  %v282_v15 = vadd.f32 1e-05, %v274_v13 }
 0x19d   :  { %423 = vrsqrt.f32 %v283_v14 }
 0x19e   :  { %425 = vrsqrt.f32 %v282_v15 }
 0x1a3   :  { %v420_v17 = vpop.eup %419 }
 0x1a4   :  { %v422_v20 = vpop.eup %421  ;;  %v289_v21 = vmul.f32 %v420_v17, %v277_v16 }
 0x1a5   :  { %v288_v22 = vmul.f32 %v422_v20, %v276_v18 }
 0x1a6   :  { %v297_v25 = vmul.f32 %v349_v19, %v289_v21 }
 0x1a7   :  { %v424_v26 = vpop.eup %423  ;;  %v296_v28 = vmul.f32 %v349_v19, %v288_v22 }
 0x1a8   :  { %v426_v29 = vpop.eup %425  ;;  %v291_v30 = vmul.f32 %v424_v26, %v279_v24  ;;  %v305_v31 = vadd.f32 %v350_v23, %v297_v25 }
 0x1a9   :  { %v290_v32 = vmul.f32 %v426_v29, %v278_v27  ;;  %v304_v33 = vadd.f32 %v350_v23, %v296_v28 }
 0x1aa   :  { %v299_v34 = vmul.f32 %v349_v19, %v291_v30  ;;  %309 = vst [vmem:[#allocation3 + $0x8] sm:$0xff] %v305_v31 }
 0x1ab   :  { %v298_v35 = vmul.f32 %v349_v19, %v290_v32  ;;  %308 = vst [vmem:[#allocation3] sm:$0xff] %v304_v33 }
 0x1ac   :  { %v307_v36 = vadd.f32 %v350_v23, %v299_v34 }
 0x1ad   :  { %v306_v37 = vadd.f32 %v350_v23, %v298_v35 }
 0x1ae   :  { %311 = vst [vmem:[#allocation3 + $0x18] sm:$0xff] %v307_v36 }
 0x1af   :  { %310 = vst [vmem:[#allocation3 + $0x10] sm:$0xff] %v306_v37 }
 0x1b0   :  { %438 = shalt.err (!%p435_p4)
}
 0x1b1   :  { %s439_s10 = scalar_lea.hbm %s573_s3, 512 }
 0x1b2   :  { %p440_p5 = scmp.ne.s32.totalorder %s573_s3, %s439_s10  ;;  %p443_p6 = scmp.lt.u32.totalorder %s439_s10, %s573_s3 }
 0x1b4   :  { %p445_p7 = pnand %p443_p6, %p440_p5 }
 0x1b6   :  { %448 = shalt.err (!%p445_p7)
}
 0x1b7   :  { %s453_s15 = smov 128   ;;  %s454_s16 = smov 8  }
 0x1b8   :  { %323 = dma.vmem_to_hbm [thread:$0]  %s318_s7, 512, %s573_s3, [#allocation4], %s453_s15, %s453_s15, %s454_s16  }
 0x1b9   :  { %449 = dma.done.wait [#allocation4], 512  }
 0x1ba   :  { %450 = vsyncadd [#allocation4], 4294966784 }
 0x1bb   :  { %327 = vsyncpa [#allocation4], 1 }

</bundles_post_ra>
